<compile_context>
chip_gen: v7x
topology: tpu7x:2x2x1
jax: 0.10.0
libtpu: 0.0.40
codegen_flags: <defaults>
</compile_context>

<pallas_src>
import functools

import numpy as np
import jax
import jax.numpy as jnp
from jax.experimental import pallas as pl
from jax.experimental.pallas import tpu as pltpu


def _round_up(x, m):
    return ((x + m - 1) // m) * m


def ordinal_ce_kernel(*refs, tail, masked, has_weights):
    """One (C, Bt) batch tile per grid step; writes a per-tile partial sum.

    refs (in order):
      logits_ref:  (C, Bt) f32   transposed logits tile (class=sublane, batch=lane)
      labels_ref:  (1, Bt) i32   labels for this batch tile (lane-dense row)
      weights_ref: (C, 1)  f32   per-class weights (only when has_weights)
      out_ref:     (1, 128) f32  this tile's partial sum (broadcast across lanes)
    """
    if has_weights:
        x_ref, lab_ref, w_ref, out_ref = refs
    else:
        x_ref, lab_ref, out_ref = refs
        w_ref = None

    pid = pl.program_id(0)

    x = x_ref[...]                                        # (C, Bt) f32
    lab = lab_ref[...]                                    # (1, Bt) i32
    c, bt = x.shape

    # Class index per sublane row; ordinal target y[j, i] = (labels[i] > j).
    cls = jax.lax.broadcasted_iota(jnp.int32, (c, bt), 0)

    # Numerically stable BCE-with-logits, reduction='none':
    #   max(x, 0) - x*y + log1p(exp(-|x|)),  with x*y folded into one select.
    loss = (jnp.maximum(x, 0.0)
            - jnp.where(lab > cls, x, 0.0)
            + jnp.log1p(jnp.exp(-jnp.abs(x))))
    if has_weights:
        loss = loss * w_ref[...]                          # (C,1) broadcast over lanes

    if masked:
        last = pl.num_programs(0) - 1

        @pl.when(pid != last)
        def _full_tile():
            out_ref[...] = jnp.broadcast_to(jnp.sum(loss), (1, 128))

        @pl.when(pid == last)
        def _ragged_tile():
            lane = jax.lax.broadcasted_iota(jnp.int32, loss.shape, 1)
            p = jnp.sum(jnp.where(lane < tail, loss, 0.0))
            out_ref[...] = jnp.broadcast_to(p, (1, 128))
    else:
        out_ref[...] = jnp.broadcast_to(jnp.sum(loss), (1, 128))


def ordinal_cross_entropy_loss(logits, labels, n_classes, weights=None, *,
                               block_cols=None):
    """Pallas TPU implementation of OrdinalCrossEntropyLoss.forward."""
    B, C = logits.shape
    assert C == n_classes

    # Transposed, lane-dense layout: class -> sublanes, batch -> lanes.
    # (Tiny relayout: ~round_up(C,8)*B*4 bytes, vs. ~25x DMA savings in-kernel
    #  for the realistic small-C ordinal case.)
    xt = logits.astype(jnp.float32).T                     # (C, B)
    lab = labels.astype(jnp.int32).reshape(1, B)          # (1, B)

    has_weights = weights is not None
    args = [xt, lab]
    in_specs = [
        pl.BlockSpec((C, None), lambda i: (0, i)),        # placeholder, fixed below
    ]

    # Block size along the batch/lane axis: as many lanes as fit a ~8 MiB
    # double-buffered working set (logits + labels blocks), multiple of 128,
    # or the full batch when it is smaller (full-dim block satisfies the
    # (8,128) rule directly, no padding, no tail mask).
    c_sub = max(8, _round_up(C, 8))                       # physical sublanes of logits block
    per_col_bytes = (c_sub + 8) * 4                       # logits + labels rows, per lane column
    budget = 8 << 20                                      # double-buffered input budget
    bt_max = max(128, ((budget // (2 * per_col_bytes)) // 128) * 128)

    if block_cols is not None:
        Bt = B if block_cols >= B else block_cols
    else:
        Bt = B if B <= bt_max else bt_max
    assert Bt == B or Bt % 128 == 0, "block_cols must be a multiple of 128 or >= B"

    grid = pl.cdiv(B, Bt)
    masked = (B % Bt) != 0
    tail = B - (grid - 1) * Bt                            # valid lanes in last tile

    in_specs = [
        pl.BlockSpec((C, Bt), lambda i: (0, i)),          # logits^T tile
        pl.BlockSpec((1, Bt), lambda i: (0, i)),          # labels row tile
    ]
    if has_weights:
        w = jnp.broadcast_to(jnp.asarray(weights, jnp.float32),
                             (n_classes,)).reshape(C, 1)  # per-class, broadcast over batch
        args.append(w)
        in_specs.append(pl.BlockSpec((C, 1), lambda i: (0, 0)))  # grid-invariant

    kernel = functools.partial(ordinal_ce_kernel, tail=tail, masked=masked,
                               has_weights=has_weights)

    out = pl.pallas_call(
        kernel,
        out_shape=jax.ShapeDtypeStruct((1, grid * 128), jnp.float32),
        grid=(grid,),
        in_specs=in_specs,
        out_specs=pl.BlockSpec((1, 128), lambda i: (0, i)),   # per-tile partial block
        compiler_params=pltpu.CompilerParams(
            dimension_semantics=("parallel",),                # no cross-tile state
            vmem_limit_bytes=32 << 20),
    )(*args)

    # Each tile's (1,128) block holds its partial sum broadcast across lanes;
    # pick lane 0 of each tile and finish the mean with a tiny XLA reduce.
    partials = out.reshape(grid, 128)[:, 0]
    return jnp.sum(partials) * (1.0 / float(B * C))


def reference_loss(logits, labels, n_classes, weights=None):
    """Pure-JAX replica of the PyTorch module for verification."""
    binary = (labels[:, None] > jnp.arange(n_classes)[None, :]).astype(jnp.float32)
    loss = (jnp.maximum(logits, 0.0) - logits * binary
            + jnp.log1p(jnp.exp(-jnp.abs(logits))))
    if weights is not None:
        loss = loss * jnp.asarray(weights, jnp.float32)
    return jnp.mean(loss)


if __name__ == "__main__":
    # Small shapes consistent with the module: logits (B, n_classes), labels (B,)
    B, C = 16, 5

    root = jax.random.PRNGKey(0)
    k_x, k_y, k_w = jax.random.split(root, 3)
    logits = jax.random.normal(k_x, (B, C), dtype=jnp.float32)
    labels = jax.random.randint(k_y, (B,), 0, C, dtype=jnp.int32)
    class_weights = jax.random.uniform(k_w, (C,), dtype=jnp.float32) + 0.5

    # weights=None path (single tile, no masking).
    loss = jax.block_until_ready(ordinal_cross_entropy_loss(logits, labels, C))
    ref = reference_loss(logits, labels, C)
    np.testing.assert_allclose(np.asarray(loss), np.asarray(ref),
                               rtol=1e-5, atol=1e-5)

    # per-class weights path.
    loss_w = jax.block_until_ready(
        ordinal_cross_entropy_loss(logits, labels, C, weights=class_weights))
    ref_w = reference_loss(logits, labels, C, weights=class_weights)
    np.testing.assert_allclose(np.asarray(loss_w), np.asarray(ref_w),
                               rtol=1e-5, atol=1e-5)

    # Multi-tile grid with a ragged last tile (exercises the pl.when mask path).
    B2, C2 = 200, 7
    k_x2, k_y2 = jax.random.split(jax.random.PRNGKey(1), 2)
    logits2 = jax.random.normal(k_x2, (B2, C2), dtype=jnp.float32)
    labels2 = jax.random.randint(k_y2, (B2,), 0, C2, dtype=jnp.int32)
    loss2 = jax.block_until_ready(
        ordinal_cross_entropy_loss(logits2, labels2, C2, block_cols=128))
    ref2 = reference_loss(logits2, labels2, C2)
    np.testing.assert_allclose(np.asarray(loss2), np.asarray(ref2),
                               rtol=1e-5, atol=1e-5)

    print("KERNEL_OK")
</pallas_src>

<mosaic_0001>
module attributes {stable_mosaic.version = 11 : i64} {
  func.func @ordinal_ce_kernel(%arg0: i32, %arg1: memref<5x16xf32, #tpu.memory_space<vmem>>, %arg2: memref<1x16xi32, #tpu.memory_space<vmem>>, %arg3: memref<1x128xf32, #tpu.memory_space<vmem>>) attributes {dimension_semantics = [#tpu.dimension_semantics<parallel>], iteration_bounds = array<i64: 1>, scalar_prefetch = 0 : i64, scratch_operands = 0 : i64, tpu.core_type = #tpu.core_type<tc>, window_params = [{transform_indices = @transform_0, window_bounds = array<i64: 5, 16>}, {transform_indices = @transform_1, window_bounds = array<i64: 1, 16>}, {transform_indices = @transform_2, window_bounds = array<i64: 1, 128>}]} {
    %c0 = arith.constant 0 : index
    %c0_0 = arith.constant 0 : index
    %0 = vector.load %arg1[%c0, %c0_0] : memref<5x16xf32, #tpu.memory_space<vmem>>, vector<5x16xf32>
    %c0_1 = arith.constant 0 : index
    %c0_2 = arith.constant 0 : index
    %1 = vector.load %arg2[%c0_1, %c0_2] : memref<1x16xi32, #tpu.memory_space<vmem>>, vector<1x16xi32>
    %2 = tpu.iota {dimensions = array<i32: 0>} : vector<5x16xi32>
    %cst = arith.constant 0.000000e+00 : f32
    %3 = vector.broadcast %cst : f32 to vector<5x16xf32>
    %4 = arith.maximumf %0, %3 : vector<5x16xf32>
    %5 = vector.broadcast %1 : vector<1x16xi32> to vector<5x16xi32>
    %6 = arith.cmpi sgt, %5, %2 : vector<5x16xi32>
    %cst_3 = arith.constant 0.000000e+00 : f32
    %7 = vector.broadcast %cst_3 : f32 to vector<5x16xf32>
    %8 = arith.select %6, %0, %7 : vector<5x16xi1>, vector<5x16xf32>
    %9 = arith.subf %4, %8 : vector<5x16xf32>
    %10 = math.absf %0 : vector<5x16xf32>
    %cst_4 = arith.constant 0.000000e+00 : f32
    %11 = vector.broadcast %cst_4 : f32 to vector<5x16xf32>
    %12 = arith.subf %11, %10 : vector<5x16xf32>
    %13 = math.exp %12 : vector<5x16xf32>
    %14 = math.log1p %13 : vector<5x16xf32>
    %15 = arith.addf %9, %14 : vector<5x16xf32>
    %16 = vector.shape_cast %15 : vector<5x16xf32> to vector<1x5x16xf32>
    %cst_5 = arith.constant dense<0.000000e+00> : vector<1xf32>
    %17 = vector.multi_reduction <add>, %16, %cst_5 [1, 2] : vector<1x5x16xf32> to vector<1xf32>
    %18 = vector.shape_cast %17 : vector<1xf32> to vector<1x1x1xf32>
    %19 = vector.extract %18[0, 0, 0] : f32 from vector<1x1x1xf32>
    %20 = vector.broadcast %19 : f32 to vector<1x128xf32>
    %c0_6 = arith.constant 0 : index
    %c0_7 = arith.constant 0 : index
    %21 = vector.load %arg3[%c0_6, %c0_7] : memref<1x128xf32, #tpu.memory_space<vmem>>, vector<1x128xf32>
    tpu.vector_store %arg3[%c0_6, %c0_7], %20 {strides = array<i32>} : memref<1x128xf32, #tpu.memory_space<vmem>>, vector<1x128xf32>,
    return
  }
  func.func @transform_0(%arg0: i32) -> (i32, i32) {
    %c0_i32 = arith.constant 0 : i32
    %c0_i32_0 = arith.constant 0 : i32
    return %c0_i32, %arg0 : i32, i32
  }
  func.func @transform_1(%arg0: i32) -> (i32, i32) {
    %c0_i32 = arith.constant 0 : i32
    %c0_i32_0 = arith.constant 0 : i32
    return %c0_i32, %arg0 : i32, i32
  }
  func.func @transform_2(%arg0: i32) -> (i32, i32) {
    %c0_i32 = arith.constant 0 : i32
    %c0_i32_0 = arith.constant 0 : i32
    return %c0_i32, %arg0 : i32, i32
  }
}

</mosaic_0001>

<bundles_post_ra>
// kernel: tpu_custom_call.1
= control target key start
LH: loop header
LB: loop body
LE: loop exit
PB: predicated region body
PF: predicated region fallthrough
CT: control target
= control target key end

     0   :  { %7 = vsyncpa [#allocation3], 0  ;;  %s179_s0 = inlined_call_operand.hbm [shape: f32[5,16], index: 0, kind: input, shape index: {}]   ;;  %s180_s1 = inlined_call_operand.vmem [shape: s32[1,16], index: 1, kind: input, shape index: {}]   ;;  %s181_s2 = inlined_call_operand.hbm [shape: f32[1,128], index: 2, kind: output, shape index: {}]  }
   0x1   :  { %8 = vsyncpa [#allocation4], 0  ;;  %s135_s9 = smov [#allocation2]   ;;  %s87_s13 = scalar_lea.hbm %s179_s0, 128 }
   0x2   :  { %s15_s10 = sshll.u32 %s135_s9, 4  ;;  %p88_p0 = scmp.ne.s32.totalorder %s179_s0, %s87_s13  ;;  %s16_s10 = int_to_ptr.vmem [resolvable:$true] %s15_s10 }
   0x3   :  { %p91_p1 = scmp.lt.u32.totalorder %s87_s13, %s179_s0 }
   0x5   :  { %p93_p2 = pnand %p91_p1, %p88_p0 }
   0x7   :  { %96 = shalt.err (!%p93_p2)
}
   0x8   :  { %s97_s18 = scalar_lea.vmem %s16_s10, 128  ;;  %p102_p4 = scmp.lt.s32.totalorder %s16_s10, %s16_s10 }
   0x9   :  { %p98_p3 = scmp.ne.s32.totalorder %s16_s10, %s97_s18  ;;  %p103_p5 = scmp.lt.s32.totalorder %s97_s18, %s97_s18 }
   0xb   :  { %p104_p6 = por %p103_p5, %p102_p4 }
   0xd   :  { %p105_p7 = pnand %p104_p6, %p98_p3 }
   0xf   :  { %108 = shalt.err (!%p105_p7)
}
  0x10   :  { %18 = dma.hbm_to_vmem [thread:$0]  %s179_s0, 128, %s16_s10, [#allocation3]  }
  0x11   :  { %131 = dma.done.wait [#allocation3], 128  }
  0x12   :  { %132 = vsyncadd [#allocation3], 4294967168  ;;  %v24_v0 = vld [vmem:[#allocation2] sm:$0x1f]  ;;  %v26_v4 = vlaneseq  ;;  %vm50_vm2 = vcmask 126976   ;;  %s136_s0 = smov [#allocation5]  }
  0x13   :  { %v36_v1 = vand.u32 2147483647, %v24_v0  ;;  %v78_v8 = vld [vmem:[%s180_s1] ss:$0 sm:$0xff]  ;;  %v28_v11 = vmax.f32 %v24_v0, 0.0  ;;  %s69_s1 = sshll.u32 %s136_s0, 4  ;;  %s70_s1 = int_to_ptr.vmem [resolvable:$true] %s69_s1 }
  0x14   :  { %v27_v7 = vshrl.u32 %v26_v4, 7  ;;  %s109_s24 = scalar_lea.vmem %s70_s1, 16  ;;  %s113_s25 = scalar_lea.vmem %s70_s1, 32 }
  0x15   :  { %v37_v2 = vsub.f32 0.0, %v36_v1  ;;  %p110_p8 = scmp.ne.s32.totalorder %s70_s1, %s109_s24  ;;  %p114_p9 = scmp.lt.s32.totalorder %s70_s1, %s70_s1 }
  0x16   :  { %vm33_vm0 = vcmp.gt.s32.totalorder %v78_v8, %v27_v7  ;;  %p115_p10 = scmp.lt.s32.totalorder %s113_s25, %s109_s24 }
  0x17   :  { %v38_v3 = vmul.f32 1.442695, %v37_v2  ;;  %v34_v13 = vsel %vm33_vm0, %v24_v0, 0.0 }
  0x18   :  { %v35_v16 = vsub.f32 %v28_v11, %v34_v13  ;;  %p116_p11 = por %p115_p10, %p114_p9 }
  0x19   :  { %83 = vpow2.f32 %v38_v3 }
  0x1a   :  { %p117_p12 = pnand %p116_p11, %p110_p8 }
  0x23   :  { %v84_v5 = vpop.eup %83 }
  0x24   :  { %v40_v6 = vadd.f32 1.0, %v84_v5  ;;  %v43_v9 = vmul.f32 -0.5, %v84_v5  ;;  %v46_v12 = vand.u32 2147483647, %v84_v5 }
  0x26   :  { %85 = vlog2.f32 %v40_v6  ;;  %v44_v10 = vadd.f32 1.0, %v43_v9  ;;  %vm47_vm1 = vcmp.lt.f32.partialorder %v46_v12, 0.0004427343 }
  0x28   :  { %v45_v14 = vmul.f32 %v84_v5, %v44_v10 }
  0x30   :  { %v86_v15 = vpop.eup %85 }
  0x31   :  { %v42_v17 = vmul.f32 0.6931472, %v86_v15 }
  0x33   :  { %v48_v18 = vsel %vm47_vm1, %v45_v14, %v42_v17 }
  0x34   :  { %v49_v19 = vadd.f32 %v48_v18, %v35_v16 }
  0x36   :  { %v51_v20 = vsel %vm50_vm2, %v49_v19, 0.0 }
  0x37   :  { %52 = vadd.xlane.f32.xlu0 %v51_v20 }
  0xc4   :  { %v53_v21 = vpop.xlane.xlu0 %52 }
  0xc5   :  { %v54_v22 = vrot.slane %v53_v21, 4 }
  0xc7   :  { %v55_v23 = vadd.f32 %v54_v22, %v53_v21 }
  0xc9   :  { %v56_v24 = vrot.slane %v55_v23, 2 }
  0xcb   :  { %v57_v25 = vadd.f32 %v56_v24, %v55_v23 }
  0xcd   :  { %v58_v26 = vrot.slane %v57_v25, 1 }
  0xcf   :  { %v59_v27 = vadd.f32 %v58_v26, %v57_v25 }
  0xd1   :  { %79 = vpush %v59_v27 }
 0x102   :  { %s80_s23 = spop %79 }
 0x103   :  { %v61_v28 = vstv %s80_s23 }
 0x104   :  { %62 = vst [vmem:[#allocation5] sm:$0x1] %v61_v28 }
 0x105   :  { %120 = shalt.err (!%p117_p12)
}
 0x106   :  { %s121_s28 = scalar_lea.hbm %s181_s2, 16 }
 0x107   :  { %p122_p13 = scmp.ne.s32.totalorder %s181_s2, %s121_s28  ;;  %p125_p0 = scmp.lt.u32.totalorder %s121_s28, %s181_s2 }
 0x109   :  { %p127_p1 = pnand %p125_p0, %p122_p13 }
 0x10b   :  { %130 = shalt.err (!%p127_p1)
}
 0x10c   :  { %72 = dma.vmem_to_hbm [thread:$0]  %s70_s1, 16, %s181_s2, [#allocation4]  }
 0x10d   :  { %133 = dma.done.wait [#allocation4], 16  }
 0x10e   :  { %134 = vsyncadd [#allocation4], 4294967280 }
 0x10f   :  { %76 = vsyncpa [#allocation3], 1 }
 0x110   :  { %77 = vsyncpa [#allocation4], 1 }

</bundles_post_ra>
